<compile_context>
chip_gen: v7x
topology: tpu7x:2x2x1
jax: 0.10.0
libtpu: 0.0.40
codegen_flags: <defaults>
</compile_context>

<pallas_src>
import functools
import numpy as np
import jax
import jax.numpy as jnp
from jax import lax
from jax.experimental import pallas as pl
from jax.experimental.pallas import tpu as pltpu

N_FEATS = 100
SUBLANE = 8
CONV1_PITCH = 128          # lane pitch of each conv1 output channel in the slab
X_LANES = 132              # 100 real features + zero pad so shifted 128-wide windows stay in bounds
DEFAULT_TB = 2048          # batch rows per grid step

# (C_out, C_in, K, stride) for conv1..conv4, matching SimpleCNN.
_CONV_CFG = ((6, 1, 3, 1), (12, 6, 10, 5), (16, 12, 5, 3), (20, 16, 5, 5))


def _round_up(n, m):
    return ((n + m - 1) // m) * m


def _conv1d_as_matmul(w, l_in, stride, row_pitch=None):
    """Dense matrix M s.t. conv1d(x) flattened C-major == x_flat @ M (exact).

    `row_pitch` lays the input channels of x_flat out with a column pitch larger
    than l_in (the extra rows of M stay zero), so a lane-aligned, 128-padded
    activation slab can be fed in directly."""
    c_out, c_in, k = w.shape
    l_out = (l_in - k) // stride + 1
    pitch = l_in if row_pitch is None else row_pitch
    co, ci, kk, t = np.meshgrid(np.arange(c_out), np.arange(c_in),
                                np.arange(k), np.arange(l_out), indexing="ij")
    rows = (ci * pitch + t * stride + kk).ravel()
    cols = (co * l_out + t).ravel()
    vals = w[co.ravel(), ci.ravel(), kk.ravel()]
    m = jnp.zeros((c_in * pitch, c_out * l_out), jnp.float32)
    return m.at[rows, cols].set(vals), l_out


def pack_simple_cnn_params(params):
    """Convert PyTorch-layout SimpleCNN params into kernel operands (done once)."""
    # conv1 stays as raw scalars (VPU path, f32, SMEM).
    w1 = params["conv1_w"].astype(jnp.float32).reshape(6, 3)        # C_in == 1
    b1 = params["conv1_b"].astype(jnp.float32).reshape(6)

    l1 = (N_FEATS - 3) // 1 + 1                                     # 98
    m2, l2 = _conv1d_as_matmul(params["conv2_w"].astype(jnp.float32), l1, 5,
                               row_pitch=CONV1_PITCH)               # (768, 216)
    b2 = jnp.repeat(params["conv2_b"].astype(jnp.float32), l2).reshape(1, -1)
    m3, l3 = _conv1d_as_matmul(params["conv3_w"].astype(jnp.float32), l2, 3)  # (216, 80)
    b3 = jnp.repeat(params["conv3_b"].astype(jnp.float32), l3).reshape(1, -1)
    m4, l4 = _conv1d_as_matmul(params["conv4_w"].astype(jnp.float32), l3, 5)  # (80, 20)
    b4 = jnp.repeat(params["conv4_b"].astype(jnp.float32), l4).reshape(1, -1)

    w5 = params["linear_w"].astype(jnp.float32).reshape(1, 20)      # f32 head (VPU)
    b5 = params["linear_b"].astype(jnp.float32).reshape(1, 1)       # SMEM scalar

    # bf16 MXU operands (accumulation stays f32 in-kernel); biases/head stay f32.
    return (w1, b1,
            m2.astype(jnp.bfloat16), b2,
            m3.astype(jnp.bfloat16), b3,
            m4.astype(jnp.bfloat16), b4,
            w5, b5)


def _simple_cnn_kernel(x_ref, w1_ref, b1_ref, m2_ref, b2_ref, m3_ref, b3_ref,
                       m4_ref, b4_ref, w5_ref, b5_ref, o_ref):
    # x_ref: (TB, 132) f32 (lanes 100..131 zero); w1/b1/b5 in SMEM;
    # m2/m3/m4 bf16 im2col matrices; b2/b3/b4 (1, C_out*L_out) f32; o_ref: (TB, 1).

    # ---- conv1 on the VPU: 3 shifted width-128 windows, 6x3 scalar FMAs ----
    xs = [x_ref[:, pl.ds(kk, CONV1_PITCH)] for kk in range(3)]      # 3 x (TB, 128) f32
    chans = []
    for co in range(6):
        acc = (w1_ref[co, 0] * xs[0] + w1_ref[co, 1] * xs[1]
               + w1_ref[co, 2] * xs[2] + b1_ref[co])
        chans.append(jnp.maximum(acc, 0.0).astype(jnp.bfloat16))
    # Lane-aligned concat -> (TB, 768) bf16; pad columns hit zero rows of m2.
    h = jnp.concatenate(chans, axis=-1)

    # ---- conv2..conv4 as bf16 MXU matmuls with f32 accumulation ----
    h = jnp.maximum(jnp.dot(h, m2_ref[...],
                            preferred_element_type=jnp.float32) + b2_ref[...], 0.0)   # (TB, 216)
    h = jnp.maximum(jnp.dot(h.astype(jnp.bfloat16), m3_ref[...],
                            preferred_element_type=jnp.float32) + b3_ref[...], 0.0)   # (TB, 80)
    h = jnp.maximum(jnp.dot(h.astype(jnp.bfloat16), m4_ref[...],
                            preferred_element_type=jnp.float32) + b4_ref[...], 0.0)   # (TB, 20)

    # ---- narrow 20 -> 1 head in f32 on VPU (mul) + XLU (lane reduce) ----
    y = jnp.sum(h * w5_ref[...], axis=-1, keepdims=True) + b5_ref[0, 0]
    o_ref[...] = y


@functools.partial(jax.jit, static_argnames=("tb",))
def simple_cnn_forward(x, packed, *, tb=DEFAULT_TB):
    """x: (B, 1, 100) f32, packed: pack_simple_cnn_params(...), returns (B,)."""
    B = x.shape[0]
    if x.ndim != 3 or x.shape[1] != 1 or x.shape[2] != N_FEATS:
        raise ValueError("Wrong input shape!")
    w1, b1, m2, b2, m3, b3, m4, b4, w5, b5 = packed

    x2 = x.reshape(B, N_FEATS).astype(jnp.float32)
    b_pad = _round_up(max(B, SUBLANE), SUBLANE)
    # Sublane-pad ragged batches and lane-pad 100 -> 132 so conv1's shifted
    # width-128 windows stay in bounds (pad is zeros, sliced away at the end).
    x2 = jnp.pad(x2, ((0, b_pad - B), (0, X_LANES - N_FEATS)))

    tb = min(tb, b_pad)
    # Keep >= 2 grid steps whenever the batch allows it so v7x's two TensorCores
    # both get work under dimension_semantics=("parallel",).
    tb = min(tb, _round_up(pl.cdiv(b_pad, 2), SUBLANE))
    grid = (pl.cdiv(b_pad, tb),)

    row_map = lambda i: (i, 0)
    const_map = lambda i: (0, 0)
    full = lambda a: pl.BlockSpec(a.shape, const_map)     # weights resident in VMEM
    smem = pl.BlockSpec(memory_space=pltpu.MemorySpace.SMEM)

    # Advisory scheduling hint for XLA around the custom call.
    flops = 2 * b_pad * (6 * 3 * CONV1_PITCH
                         + m2.shape[0] * m2.shape[1]
                         + m3.shape[0] * m3.shape[1]
                         + m4.shape[0] * m4.shape[1] + 20)
    weight_bytes = sum(int(np.prod(a.shape)) * a.dtype.itemsize
                       for a in (m2, b2, m3, b3, m4, b4, w5))
    bytes_accessed = b_pad * (X_LANES * 4 + 4) + weight_bytes

    out = pl.pallas_call(
        _simple_cnn_kernel,
        out_shape=jax.ShapeDtypeStruct((b_pad, 1), jnp.float32),
        grid=grid,
        in_specs=[
            pl.BlockSpec((tb, X_LANES), row_map),          # x tiled over batch
            smem, smem,                                    # conv1 weights / bias scalars
            full(m2), full(b2),
            full(m3), full(b3),
            full(m4), full(b4),
            full(w5),
            smem,                                          # linear bias scalar
        ],
        out_specs=pl.BlockSpec((tb, 1), row_map),
        compiler_params=pltpu.CompilerParams(
            dimension_semantics=("parallel",),             # batch tiles shard across TCs
            vmem_limit_bytes=32 * 1024 * 1024,             # v5e default (16 MiB) too small at TB=2048
        ),
        cost_estimate=pl.CostEstimate(flops=flops, transcendentals=0,
                                      bytes_accessed=bytes_accessed),
        # Note: weight BlockSpecs are constant-index; they would ideally be
        # single-buffered, but the ~0.4 MiB double-buffer waste is negligible here.
    )(x2, w1, b1, m2, b2, m3, b3, m4, b4, w5, b5)

    return out[:B, 0]


def _reference_forward(x, params):
    """Pure-JAX reference of SimpleCNN.forward (lax conv path)."""
    h = x.astype(jnp.float32)                     # (B, 1, 100)
    for idx, (_c_out, _c_in, _k, stride) in enumerate(_CONV_CFG, start=1):
        w = params[f"conv{idx}_w"].astype(jnp.float32)
        b = params[f"conv{idx}_b"].astype(jnp.float32)
        h = lax.conv_general_dilated(
            h, w, window_strides=(stride,), padding="VALID",
            dimension_numbers=("NCH", "OIH", "NCH"),
            precision=lax.Precision.HIGHEST)
        h = jnp.maximum(h + b[None, :, None], 0.0)
    h = h.reshape(h.shape[0], -1)                 # (B, 20)
    y = jnp.matmul(h, params["linear_w"].astype(jnp.float32).T,
                   precision=lax.Precision.HIGHEST) + params["linear_b"]
    return y.reshape(-1)


if __name__ == "__main__":
    key = jax.random.PRNGKey(0)
    keys = jax.random.split(key, 12)

    # Deterministic synthetic parameters with the exact SimpleCNN shapes.
    params = {}
    ki = 1
    for idx, (c_out, c_in, k, _stride) in enumerate(_CONV_CFG, start=1):
        params[f"conv{idx}_w"] = 0.1 * jax.random.normal(
            keys[ki], (c_out, c_in, k), dtype=jnp.float32); ki += 1
        params[f"conv{idx}_b"] = 0.1 * jax.random.normal(
            keys[ki], (c_out,), dtype=jnp.float32); ki += 1
    params["linear_w"] = 0.1 * jax.random.normal(keys[ki], (1, 20), dtype=jnp.float32); ki += 1
    params["linear_b"] = 0.1 * jax.random.normal(keys[ki], (1,), dtype=jnp.float32)

    packed = pack_simple_cnn_params(params)

    # batch=2: minimal case; batch=19: ragged batch + multi-step (partial) grid.
    for batch in (2, 19):
        x = jax.random.normal(keys[0], (batch, 1, N_FEATS), dtype=jnp.float32)
        y = jax.block_until_ready(simple_cnn_forward(x, packed))
        y_ref = _reference_forward(x, params)
        assert y.shape == (batch,)
        # bf16 MXU operands (f32 accumulation) -> slightly looser tolerance than pure f32.
        assert jnp.allclose(y, y_ref, atol=1e-2, rtol=1e-2), (batch, y, y_ref)

    print("KERNEL_OK")
</pallas_src>

<mosaic_0001>
module attributes {stable_mosaic.version = 11 : i64} {
  func.func @_simple_cnn_kernel(%arg0: i32, %arg1: memref<8x132xf32, #tpu.memory_space<vmem>>, %arg2: memref<6x3xf32, #tpu.memory_space<smem>>, %arg3: memref<6xf32, #tpu.memory_space<smem>>, %arg4: memref<768x216xbf16, #tpu.memory_space<vmem>>, %arg5: memref<1x216xf32, #tpu.memory_space<vmem>>, %arg6: memref<216x80xbf16, #tpu.memory_space<vmem>>, %arg7: memref<1x80xf32, #tpu.memory_space<vmem>>, %arg8: memref<80x20xbf16, #tpu.memory_space<vmem>>, %arg9: memref<1x20xf32, #tpu.memory_space<vmem>>, %arg10: memref<1x20xf32, #tpu.memory_space<vmem>>, %arg11: memref<1x1xf32, #tpu.memory_space<smem>>, %arg12: memref<8x1xf32, #tpu.memory_space<vmem>>) attributes {dimension_semantics = [#tpu.dimension_semantics<parallel>], iteration_bounds = array<i64: 1>, scalar_prefetch = 0 : i64, scratch_operands = 0 : i64, tpu.core_type = #tpu.core_type<tc>, window_params = [{transform_indices = @transform_0, window_bounds = array<i64: 8, 132>}, {transform_indices = @transform_1, window_bounds = array<i64: 6, 3>}, {transform_indices = @transform_2, window_bounds = array<i64: 6>}, {pipeline_mode = #tpu.pipeline_mode<synchronous>, transform_indices = @transform_3, window_bounds = array<i64: 768, 216>}, {pipeline_mode = #tpu.pipeline_mode<synchronous>, transform_indices = @transform_4, window_bounds = array<i64: 1, 216>}, {pipeline_mode = #tpu.pipeline_mode<synchronous>, transform_indices = @transform_5, window_bounds = array<i64: 216, 80>}, {pipeline_mode = #tpu.pipeline_mode<synchronous>, transform_indices = @transform_6, window_bounds = array<i64: 1, 80>}, {pipeline_mode = #tpu.pipeline_mode<synchronous>, transform_indices = @transform_7, window_bounds = array<i64: 80, 20>}, {pipeline_mode = #tpu.pipeline_mode<synchronous>, transform_indices = @transform_8, window_bounds = array<i64: 1, 20>}, {pipeline_mode = #tpu.pipeline_mode<synchronous>, transform_indices = @transform_9, window_bounds = array<i64: 1, 20>}, {transform_indices = @transform_10, window_bounds = array<i64: 1, 1>}, {transform_indices = @transform_11, window_bounds = array<i64: 8, 1>}]} {
    %c0 = arith.constant 0 : index
    %c0_0 = arith.constant 0 : index
    %0 = vector.load %arg1[%c0, %c0_0] : memref<8x132xf32, #tpu.memory_space<vmem>>, vector<8x128xf32>
    %c0_1 = arith.constant 0 : index
    %c1 = arith.constant 1 : index
    %1 = vector.load %arg1[%c0_1, %c1] : memref<8x132xf32, #tpu.memory_space<vmem>>, vector<8x128xf32>
    %c0_2 = arith.constant 0 : index
    %c2 = arith.constant 2 : index
    %2 = vector.load %arg1[%c0_2, %c2] : memref<8x132xf32, #tpu.memory_space<vmem>>, vector<8x128xf32>
    %c0_3 = arith.constant 0 : index
    %c0_4 = arith.constant 0 : index
    %3 = memref.load %arg2[%c0_3, %c0_4] : memref<6x3xf32, #tpu.memory_space<smem>>
    %4 = vector.broadcast %3 : f32 to vector<8x128xf32>
    %5 = arith.mulf %4, %0 : vector<8x128xf32>
    %c0_5 = arith.constant 0 : index
    %c1_6 = arith.constant 1 : index
    %6 = memref.load %arg2[%c0_5, %c1_6] : memref<6x3xf32, #tpu.memory_space<smem>>
    %7 = vector.broadcast %6 : f32 to vector<8x128xf32>
    %8 = arith.mulf %7, %1 : vector<8x128xf32>
    %9 = arith.addf %5, %8 : vector<8x128xf32>
    %c0_7 = arith.constant 0 : index
    %c2_8 = arith.constant 2 : index
    %10 = memref.load %arg2[%c0_7, %c2_8] : memref<6x3xf32, #tpu.memory_space<smem>>
    %11 = vector.broadcast %10 : f32 to vector<8x128xf32>
    %12 = arith.mulf %11, %2 : vector<8x128xf32>
    %13 = arith.addf %9, %12 : vector<8x128xf32>
    %c0_9 = arith.constant 0 : index
    %14 = memref.load %arg3[%c0_9] : memref<6xf32, #tpu.memory_space<smem>>
    %15 = vector.broadcast %14 : f32 to vector<8x128xf32>
    %16 = arith.addf %13, %15 : vector<8x128xf32>
    %cst = arith.constant 0.000000e+00 : f32
    %17 = vector.broadcast %cst : f32 to vector<8x128xf32>
    %18 = arith.maximumf %16, %17 : vector<8x128xf32>
    %19 = arith.truncf %18 : vector<8x128xf32> to vector<8x128xbf16>
    %c1_10 = arith.constant 1 : index
    %c0_11 = arith.constant 0 : index
    %20 = memref.load %arg2[%c1_10, %c0_11] : memref<6x3xf32, #tpu.memory_space<smem>>
    %21 = vector.broadcast %20 : f32 to vector<8x128xf32>
    %22 = arith.mulf %21, %0 : vector<8x128xf32>
    %c1_12 = arith.constant 1 : index
    %c1_13 = arith.constant 1 : index
    %23 = memref.load %arg2[%c1_12, %c1_13] : memref<6x3xf32, #tpu.memory_space<smem>>
    %24 = vector.broadcast %23 : f32 to vector<8x128xf32>
    %25 = arith.mulf %24, %1 : vector<8x128xf32>
    %26 = arith.addf %22, %25 : vector<8x128xf32>
    %c1_14 = arith.constant 1 : index
    %c2_15 = arith.constant 2 : index
    %27 = memref.load %arg2[%c1_14, %c2_15] : memref<6x3xf32, #tpu.memory_space<smem>>
    %28 = vector.broadcast %27 : f32 to vector<8x128xf32>
    %29 = arith.mulf %28, %2 : vector<8x128xf32>
    %30 = arith.addf %26, %29 : vector<8x128xf32>
    %c1_16 = arith.constant 1 : index
    %31 = memref.load %arg3[%c1_16] : memref<6xf32, #tpu.memory_space<smem>>
    %32 = vector.broadcast %31 : f32 to vector<8x128xf32>
    %33 = arith.addf %30, %32 : vector<8x128xf32>
    %cst_17 = arith.constant 0.000000e+00 : f32
    %34 = vector.broadcast %cst_17 : f32 to vector<8x128xf32>
    %35 = arith.maximumf %33, %34 : vector<8x128xf32>
    %36 = arith.truncf %35 : vector<8x128xf32> to vector<8x128xbf16>
    %c2_18 = arith.constant 2 : index
    %c0_19 = arith.constant 0 : index
    %37 = memref.load %arg2[%c2_18, %c0_19] : memref<6x3xf32, #tpu.memory_space<smem>>
    %38 = vector.broadcast %37 : f32 to vector<8x128xf32>
    %39 = arith.mulf %38, %0 : vector<8x128xf32>
    %c2_20 = arith.constant 2 : index
    %c1_21 = arith.constant 1 : index
    %40 = memref.load %arg2[%c2_20, %c1_21] : memref<6x3xf32, #tpu.memory_space<smem>>
    %41 = vector.broadcast %40 : f32 to vector<8x128xf32>
    %42 = arith.mulf %41, %1 : vector<8x128xf32>
    %43 = arith.addf %39, %42 : vector<8x128xf32>
    %c2_22 = arith.constant 2 : index
    %c2_23 = arith.constant 2 : index
    %44 = memref.load %arg2[%c2_22, %c2_23] : memref<6x3xf32, #tpu.memory_space<smem>>
    %45 = vector.broadcast %44 : f32 to vector<8x128xf32>
    %46 = arith.mulf %45, %2 : vector<8x128xf32>
    %47 = arith.addf %43, %46 : vector<8x128xf32>
    %c2_24 = arith.constant 2 : index
    %48 = memref.load %arg3[%c2_24] : memref<6xf32, #tpu.memory_space<smem>>
    %49 = vector.broadcast %48 : f32 to vector<8x128xf32>
    %50 = arith.addf %47, %49 : vector<8x128xf32>
    %cst_25 = arith.constant 0.000000e+00 : f32
    %51 = vector.broadcast %cst_25 : f32 to vector<8x128xf32>
    %52 = arith.maximumf %50, %51 : vector<8x128xf32>
    %53 = arith.truncf %52 : vector<8x128xf32> to vector<8x128xbf16>
    %c3 = arith.constant 3 : index
    %c0_26 = arith.constant 0 : index
    %54 = memref.load %arg2[%c3, %c0_26] : memref<6x3xf32, #tpu.memory_space<smem>>
    %55 = vector.broadcast %54 : f32 to vector<8x128xf32>
    %56 = arith.mulf %55, %0 : vector<8x128xf32>
    %c3_27 = arith.constant 3 : index
    %c1_28 = arith.constant 1 : index
    %57 = memref.load %arg2[%c3_27, %c1_28] : memref<6x3xf32, #tpu.memory_space<smem>>
    %58 = vector.broadcast %57 : f32 to vector<8x128xf32>
    %59 = arith.mulf %58, %1 : vector<8x128xf32>
    %60 = arith.addf %56, %59 : vector<8x128xf32>
    %c3_29 = arith.constant 3 : index
    %c2_30 = arith.constant 2 : index
    %61 = memref.load %arg2[%c3_29, %c2_30] : memref<6x3xf32, #tpu.memory_space<smem>>
    %62 = vector.broadcast %61 : f32 to vector<8x128xf32>
    %63 = arith.mulf %62, %2 : vector<8x128xf32>
    %64 = arith.addf %60, %63 : vector<8x128xf32>
    %c3_31 = arith.constant 3 : index
    %65 = memref.load %arg3[%c3_31] : memref<6xf32, #tpu.memory_space<smem>>
    %66 = vector.broadcast %65 : f32 to vector<8x128xf32>
    %67 = arith.addf %64, %66 : vector<8x128xf32>
    %cst_32 = arith.constant 0.000000e+00 : f32
    %68 = vector.broadcast %cst_32 : f32 to vector<8x128xf32>
    %69 = arith.maximumf %67, %68 : vector<8x128xf32>
    %70 = arith.truncf %69 : vector<8x128xf32> to vector<8x128xbf16>
    %c4 = arith.constant 4 : index
    %c0_33 = arith.constant 0 : index
    %71 = memref.load %arg2[%c4, %c0_33] : memref<6x3xf32, #tpu.memory_space<smem>>
    %72 = vector.broadcast %71 : f32 to vector<8x128xf32>
    %73 = arith.mulf %72, %0 : vector<8x128xf32>
    %c4_34 = arith.constant 4 : index
    %c1_35 = arith.constant 1 : index
    %74 = memref.load %arg2[%c4_34, %c1_35] : memref<6x3xf32, #tpu.memory_space<smem>>
    %75 = vector.broadcast %74 : f32 to vector<8x128xf32>
    %76 = arith.mulf %75, %1 : vector<8x128xf32>
    %77 = arith.addf %73, %76 : vector<8x128xf32>
    %c4_36 = arith.constant 4 : index
    %c2_37 = arith.constant 2 : index
    %78 = memref.load %arg2[%c4_36, %c2_37] : memref<6x3xf32, #tpu.memory_space<smem>>
    %79 = vector.broadcast %78 : f32 to vector<8x128xf32>
    %80 = arith.mulf %79, %2 : vector<8x128xf32>
    %81 = arith.addf %77, %80 : vector<8x128xf32>
    %c4_38 = arith.constant 4 : index
    %82 = memref.load %arg3[%c4_38] : memref<6xf32, #tpu.memory_space<smem>>
    %83 = vector.broadcast %82 : f32 to vector<8x128xf32>
    %84 = arith.addf %81, %83 : vector<8x128xf32>
    %cst_39 = arith.constant 0.000000e+00 : f32
    %85 = vector.broadcast %cst_39 : f32 to vector<8x128xf32>
    %86 = arith.maximumf %84, %85 : vector<8x128xf32>
    %87 = arith.truncf %86 : vector<8x128xf32> to vector<8x128xbf16>
    %c5 = arith.constant 5 : index
    %c0_40 = arith.constant 0 : index
    %88 = memref.load %arg2[%c5, %c0_40] : memref<6x3xf32, #tpu.memory_space<smem>>
    %89 = vector.broadcast %88 : f32 to vector<8x128xf32>
    %90 = arith.mulf %89, %0 : vector<8x128xf32>
    %c5_41 = arith.constant 5 : index
    %c1_42 = arith.constant 1 : index
    %91 = memref.load %arg2[%c5_41, %c1_42] : memref<6x3xf32, #tpu.memory_space<smem>>
    %92 = vector.broadcast %91 : f32 to vector<8x128xf32>
    %93 = arith.mulf %92, %1 : vector<8x128xf32>
    %94 = arith.addf %90, %93 : vector<8x128xf32>
    %c5_43 = arith.constant 5 : index
    %c2_44 = arith.constant 2 : index
    %95 = memref.load %arg2[%c5_43, %c2_44] : memref<6x3xf32, #tpu.memory_space<smem>>
    %96 = vector.broadcast %95 : f32 to vector<8x128xf32>
    %97 = arith.mulf %96, %2 : vector<8x128xf32>
    %98 = arith.addf %94, %97 : vector<8x128xf32>
    %c5_45 = arith.constant 5 : index
    %99 = memref.load %arg3[%c5_45] : memref<6xf32, #tpu.memory_space<smem>>
    %100 = vector.broadcast %99 : f32 to vector<8x128xf32>
    %101 = arith.addf %98, %100 : vector<8x128xf32>
    %cst_46 = arith.constant 0.000000e+00 : f32
    %102 = vector.broadcast %cst_46 : f32 to vector<8x128xf32>
    %103 = arith.maximumf %101, %102 : vector<8x128xf32>
    %104 = arith.truncf %103 : vector<8x128xf32> to vector<8x128xbf16>
    %105 = tpu.concatenate %19, %36, %53, %70, %87, %104 in 1 : vector<8x128xbf16>, vector<8x128xbf16>, vector<8x128xbf16>, vector<8x128xbf16>, vector<8x128xbf16>, vector<8x128xbf16> -> vector<8x768xbf16>
    %c0_47 = arith.constant 0 : index
    %c0_48 = arith.constant 0 : index
    %106 = vector.load %arg4[%c0_47, %c0_48] : memref<768x216xbf16, #tpu.memory_space<vmem>>, vector<768x216xbf16>
    %cst_49 = arith.constant dense<0.000000e+00> : vector<8x216xf32>
    %107 = tpu.matmul %105, %106, %cst_49 {dimension_numbers = #tpu.dot_dimension_numbers<[1], [0], [0], [1], [0, 0, 1, 1], [], []>} : vector<8x768xbf16>, vector<768x216xbf16>, vector<8x216xf32> -> vector<8x216xf32>
    %c0_50 = arith.constant 0 : index
    %c0_51 = arith.constant 0 : index
    %108 = vector.load %arg5[%c0_50, %c0_51] : memref<1x216xf32, #tpu.memory_space<vmem>>, vector<1x216xf32>
    %109 = vector.broadcast %108 : vector<1x216xf32> to vector<8x216xf32>
    %110 = arith.addf %107, %109 : vector<8x216xf32>
    %cst_52 = arith.constant 0.000000e+00 : f32
    %111 = vector.broadcast %cst_52 : f32 to vector<8x216xf32>
    %112 = arith.maximumf %110, %111 : vector<8x216xf32>
    %113 = arith.truncf %112 : vector<8x216xf32> to vector<8x216xbf16>
    %c0_53 = arith.constant 0 : index
    %c0_54 = arith.constant 0 : index
    %114 = vector.load %arg6[%c0_53, %c0_54] : memref<216x80xbf16, #tpu.memory_space<vmem>>, vector<216x80xbf16>
    %cst_55 = arith.constant dense<0.000000e+00> : vector<8x80xf32>
    %115 = tpu.matmul %113, %114, %cst_55 {dimension_numbers = #tpu.dot_dimension_numbers<[1], [0], [0], [1], [0, 0, 1, 1], [], []>} : vector<8x216xbf16>, vector<216x80xbf16>, vector<8x80xf32> -> vector<8x80xf32>
    %c0_56 = arith.constant 0 : index
    %c0_57 = arith.constant 0 : index
    %116 = vector.load %arg7[%c0_56, %c0_57] : memref<1x80xf32, #tpu.memory_space<vmem>>, vector<1x80xf32>
    %117 = vector.broadcast %116 : vector<1x80xf32> to vector<8x80xf32>
    %118 = arith.addf %115, %117 : vector<8x80xf32>
    %cst_58 = arith.constant 0.000000e+00 : f32
    %119 = vector.broadcast %cst_58 : f32 to vector<8x80xf32>
    %120 = arith.maximumf %118, %119 : vector<8x80xf32>
    %121 = arith.truncf %120 : vector<8x80xf32> to vector<8x80xbf16>
    %c0_59 = arith.constant 0 : index
    %c0_60 = arith.constant 0 : index
    %122 = vector.load %arg8[%c0_59, %c0_60] : memref<80x20xbf16, #tpu.memory_space<vmem>>, vector<80x20xbf16>
    %cst_61 = arith.constant dense<0.000000e+00> : vector<8x20xf32>
    %123 = tpu.matmul %121, %122, %cst_61 {dimension_numbers = #tpu.dot_dimension_numbers<[1], [0], [0], [1], [0, 0, 1, 1], [], []>} : vector<8x80xbf16>, vector<80x20xbf16>, vector<8x20xf32> -> vector<8x20xf32>
    %c0_62 = arith.constant 0 : index
    %c0_63 = arith.constant 0 : index
    %124 = vector.load %arg9[%c0_62, %c0_63] : memref<1x20xf32, #tpu.memory_space<vmem>>, vector<1x20xf32>
    %125 = vector.broadcast %124 : vector<1x20xf32> to vector<8x20xf32>
    %126 = arith.addf %123, %125 : vector<8x20xf32>
    %cst_64 = arith.constant 0.000000e+00 : f32
    %127 = vector.broadcast %cst_64 : f32 to vector<8x20xf32>
    %128 = arith.maximumf %126, %127 : vector<8x20xf32>
    %c0_65 = arith.constant 0 : index
    %c0_66 = arith.constant 0 : index
    %129 = vector.load %arg10[%c0_65, %c0_66] : memref<1x20xf32, #tpu.memory_space<vmem>>, vector<1x20xf32>
    %130 = vector.broadcast %129 : vector<1x20xf32> to vector<8x20xf32>
    %131 = arith.mulf %128, %130 : vector<8x20xf32>
    %cst_67 = arith.constant dense<0.000000e+00> : vector<8xf32>
    %132 = vector.multi_reduction <add>, %131, %cst_67 [1] : vector<8x20xf32> to vector<8xf32>
    %133 = vector.shape_cast %132 : vector<8xf32> to vector<8x1xf32>
    %c0_68 = arith.constant 0 : index
    %c0_69 = arith.constant 0 : index
    %134 = memref.load %arg11[%c0_68, %c0_69] : memref<1x1xf32, #tpu.memory_space<smem>>
    %135 = vector.broadcast %134 : f32 to vector<8x1xf32>
    %136 = arith.addf %133, %135 : vector<8x1xf32>
    %c0_70 = arith.constant 0 : index
    %c0_71 = arith.constant 0 : index
    %137 = vector.load %arg12[%c0_70, %c0_71] : memref<8x1xf32, #tpu.memory_space<vmem>>, vector<8x1xf32>
    tpu.vector_store %arg12[%c0_70, %c0_71], %136 {strides = array<i32>} : memref<8x1xf32, #tpu.memory_space<vmem>>, vector<8x1xf32>,
    return
  }
  func.func @transform_0(%arg0: i32) -> (i32, i32) {
    %c0_i32 = arith.constant 0 : i32
    %c0_i32_0 = arith.constant 0 : i32
    return %arg0, %c0_i32 : i32, i32
  }
  func.func @transform_1(%arg0: i32) -> (i32, i32) {
    %c0_i32 = arith.constant 0 : i32
    %c0_i32_0 = arith.constant 0 : i32
    %c0_i32_1 = arith.constant 0 : i32
    return %c0_i32, %c0_i32_0 : i32, i32
  }
  func.func @transform_2(%arg0: i32) -> i32 {
    %c0_i32 = arith.constant 0 : i32
    %c0_i32_0 = arith.constant 0 : i32
    return %c0_i32 : i32
  }
  func.func @transform_3(%arg0: i32) -> (i32, i32) {
    %c0_i32 = arith.constant 0 : i32
    %c0_i32_0 = arith.constant 0 : i32
    %c0_i32_1 = arith.constant 0 : i32
    return %c0_i32, %c0_i32_0 : i32, i32
  }
  func.func @transform_4(%arg0: i32) -> (i32, i32) {
    %c0_i32 = arith.constant 0 : i32
    %c0_i32_0 = arith.constant 0 : i32
    %c0_i32_1 = arith.constant 0 : i32
    return %c0_i32, %c0_i32_0 : i32, i32
  }
  func.func @transform_5(%arg0: i32) -> (i32, i32) {
    %c0_i32 = arith.constant 0 : i32
    %c0_i32_0 = arith.constant 0 : i32
    %c0_i32_1 = arith.constant 0 : i32
    return %c0_i32, %c0_i32_0 : i32, i32
  }
  func.func @transform_6(%arg0: i32) -> (i32, i32) {
    %c0_i32 = arith.constant 0 : i32
    %c0_i32_0 = arith.constant 0 : i32
    %c0_i32_1 = arith.constant 0 : i32
    return %c0_i32, %c0_i32_0 : i32, i32
  }
  func.func @transform_7(%arg0: i32) -> (i32, i32) {
    %c0_i32 = arith.constant 0 : i32
    %c0_i32_0 = arith.constant 0 : i32
    %c0_i32_1 = arith.constant 0 : i32
    return %c0_i32, %c0_i32_0 : i32, i32
  }
  func.func @transform_8(%arg0: i32) -> (i32, i32) {
    %c0_i32 = arith.constant 0 : i32
    %c0_i32_0 = arith.constant 0 : i32
    %c0_i32_1 = arith.constant 0 : i32
    return %c0_i32, %c0_i32_0 : i32, i32
  }
  func.func @transform_9(%arg0: i32) -> (i32, i32) {
    %c0_i32 = arith.constant 0 : i32
    %c0_i32_0 = arith.constant 0 : i32
    %c0_i32_1 = arith.constant 0 : i32
    return %c0_i32, %c0_i32_0 : i32, i32
  }
  func.func @transform_10(%arg0: i32) -> (i32, i32) {
    %c0_i32 = arith.constant 0 : i32
    %c0_i32_0 = arith.constant 0 : i32
    %c0_i32_1 = arith.constant 0 : i32
    return %c0_i32, %c0_i32_0 : i32, i32
  }
  func.func @transform_11(%arg0: i32) -> (i32, i32) {
    %c0_i32 = arith.constant 0 : i32
    %c0_i32_0 = arith.constant 0 : i32
    return %arg0, %c0_i32 : i32, i32
  }
}

</mosaic_0001>

<bundles_post_ra>
// kernel: simple_cnn_forward.1
= control target key start
LH: loop header
LB: loop body
LE: loop exit
PB: predicated region body
PF: predicated region fallthrough
CT: control target
= control target key end

     0   :  { %17 = vsyncpa [#allocation4], 0  ;;  %s2207_s0 = inlined_call_operand.vmem [shape: f32[8,132], index: 0, kind: input, shape index: {}]   ;;  %s2208_s1 = inlined_call_operand.vmem [shape: f32[6,3], index: 1, kind: input, shape index: {}]   ;;  %s2209_s2 = inlined_call_operand.vmem [shape: f32[6], index: 2, kind: input, shape index: {}]   ;;  %s2210_s3 = inlined_call_operand.vmem [shape: bf16[768,216], index: 3, kind: input, shape index: {}]   ;;  %s2211_s4 = inlined_call_operand.vmem [shape: f32[1,216], index: 4, kind: input, shape index: {}]   ;;  %s2212_s5 = inlined_call_operand.vmem [shape: bf16[216,80], index: 5, kind: input, shape index: {}]   ;;  %s2213_s6 = inlined_call_operand.vmem [shape: f32[1,80], index: 6, kind: input, shape index: {}]   ;;  %s2214_s7 = inlined_call_operand.vmem [shape: bf16[80,20], index: 7, kind: input, shape index: {}]   ;;  %s2215_s8 = inlined_call_operand.vmem [shape: f32[1,20], index: 8, kind: input, shape index: {}]   ;;  %s2216_s9 = inlined_call_operand.vmem [shape: f32[1,20], index: 9, kind: input, shape index: {}]   ;;  %s2217_s10 = inlined_call_operand.<no memory space> [shape: f32[1,1], index: 10, kind: input, shape index: {}]   ;;  %s2218_s11 = inlined_call_operand.vmem [shape: f32[8,1], index: 11, kind: output, shape index: {}]  }
   0x1   :  { %s27_s19 = sshll.u32 %s2208_s1, 4  ;;  %s28_s19 = int_to_ptr.vmem [resolvable:$true] %s27_s19 }
   0x2   :  { %18 = vsyncpa [#allocation6], 0  ;;  %s37_s22 = sshll.u32 %s2209_s2, 4  ;;  %s1608_s23 = scalar_lea.vmem %s28_s19, 128  ;;  %s38_s22 = int_to_ptr.vmem [resolvable:$true] %s37_s22 }
   0x3   :  { %p1609_p0 = scmp.ne.s32.totalorder %s28_s19, %s1608_s23  ;;  %p1613_p1 = scmp.lt.s32.totalorder %s28_s19, %s28_s19 }
   0x4   :  { %p1614_p2 = scmp.lt.s32.totalorder %s1608_s23, %s1608_s23 }
   0x6   :  { %p1615_p3 = por %p1614_p2, %p1613_p1 }
   0x8   :  { %p1616_p4 = pnand %p1615_p3, %p1609_p0 }
   0xa   :  { %1619 = shalt.err (!%p1616_p4)
}
   0xb   :  { %s1636_s24 = smov [#allocation3]   ;;  %s1620_s25 = scalar_lea.vmem %s38_s22, 16 }
   0xc   :  { %30 = dma.vmem_to_smem %s28_s19, 128, %s1636_s24, [#allocation4]  }
   0xd   :  { %p1621_p5 = scmp.ne.s32.totalorder %s38_s22, %s1620_s25  ;;  %p1625_p6 = scmp.lt.s32.totalorder %s38_s22, %s38_s22 }
   0xe   :  { %p1626_p7 = scmp.lt.s32.totalorder %s1620_s25, %s1620_s25 }
  0x10   :  { %p1627_p8 = por %p1626_p7, %p1625_p6 }
  0x12   :  { %p1628_p9 = pnand %p1627_p8, %p1621_p5 }
  0x14   :  { %1631 = shalt.err (!%p1628_p9)
}
  0x15   :  { %s1637_s1 = smov [#allocation5]  }
  0x16   :  { %40 = dma.vmem_to_smem %s38_s22, 16, %s1637_s1, [#allocation6]  }
  0x17   :  { %1632 = dma.done.wait [#allocation4], 128  }
  0x18   :  { %1633 = vsyncadd [#allocation4], 4294967168 }
  0x19   :  { %1634 = dma.done.wait [#allocation6], 16  }
  0x1a   :  { %1635 = vsyncadd [#allocation6], 4294967280 }
  0x1b   :  { %63 = sfence }
  0x1c   :  { %s1279_s2 = sld [smem:[#allocation3 + $0x181]]  ;;  %v1445_v0 = vld [vmem:[%s2210_s3 + $0x104] ss:$8 sps:$4 sm:$0xff]   ;;  %s1712_s29 = sld [smem:[#allocation3 + $0x182]]  ;;  %v1447_v1 = vld [vmem:[%s2210_s3 + $0x100] ss:$8 sps:$4 sm:$0xff]  }
  0x1d   :  { %s1275_s26 = sld [smem:[#allocation3 + $0x101]]  ;;  %902 = vmatprep.subr.bf16.mxu0 %v1445_v0  ;;  %v1720_v2 = vld [vmem:[%s2207_s0] sm:$0xff]  ;;  %v1448_v3 = vld [vmem:[%s2210_s3 + $0x114] ss:$8 sps:$4 sm:$0xff]   ;;  %v1450_v4 = vld [vmem:[%s2210_s3 + $0x110] ss:$8 sps:$4 sm:$0xff]  }
  0x1e   :  { %903 = vmatpush1.bf16.msra.mxu0 %v1447_v1  ;;  %v1731_v5 = vld [vmem:[%s2207_s0 + $0x8] sm:$0xff]  ;;  %s1733_s21 = sld [smem:[#allocation3 + $0x102]]  ;;  %s1638_s0 = smov 127   ;;  %v1454_v15 = vld [vmem:[%s2210_s3 + $0x134] ss:$8 sps:$4 sm:$0xff]   ;;  %vm80_vm0 = vcmask 1039360  }
  0x1f   :  { %904 = vmatprep.subr.bf16.mxu0 %v1448_v3  ;;  %v1451_v9 = vld [vmem:[%s2210_s3 + $0x124] ss:$8 sps:$4 sm:$0xff]   ;;  %v1453_v11 = vld [vmem:[%s2210_s3 + $0x120] ss:$8 sps:$4 sm:$0xff]   ;;  %s1748_s1 = sld [smem:[#allocation3 + $0x81]]  ;;  %s1639_s15 = smov 126  }
  0x20   :  { %v1456_v16 = vld [vmem:[%s2210_s3 + $0x130] ss:$8 sps:$4 sm:$0xff]   ;;  %v1457_v18 = vld [vmem:[%s2210_s3 + $0x144] ss:$8 sps:$4 sm:$0xff]   ;;  %v1459_v21 = vld [vmem:[%s2210_s3 + $0x140] ss:$8 sps:$4 sm:$0xff]  }
  0x21   :  { %v1460_v23 = vld [vmem:[%s2210_s3 + $0x154] ss:$8 sps:$4 sm:$0xff]   ;;  %s1777_s18 = sld [smem:[#allocation3 + $0x82]]  ;;  %v1462_v26 = vld [vmem:[%s2210_s3 + $0x150] ss:$8 sps:$4 sm:$0xff]   ;;  %s1281_s30 = sld [smem:[#allocation5 + $0x3]] }
  0x22   :  { %v175_v6 = vstv %s1279_s2  ;;  %905 = vmatpush1.bf16.msra.mxu0 %v1450_v4  ;;  %v188_v14 = vstv %s1712_s29  ;;  %s1764_s29 = sld [smem:[#allocation3 + $0x1]]  ;;  %v1475_v27 = vld [vmem:[%s2210_s3 + $0x4] ss:$8 sps:$4 sm:$0xff]   ;;  %v1477_v28 = vld [vmem:[%s2210_s3] ss:$8 sps:$4 sm:$0xff]   ;;  %s1818_s19 = sld [smem:[#allocation3 + $0x2]] }
  0x23   :  { %v176_v7 = vmul.f32 %v175_v6, %v1720_v2  ;;  %v141_v8 = vstv %s1275_s26  ;;  %v177_v12 = vmul.f32 %v175_v6, %v1731_v5  ;;  %906 = vmatprep.subr.bf16.mxu0 %v1451_v9  ;;  %v189_v17 = vmul.f32 %v188_v14, %v1720_v2  ;;  %v1463_v30 = vld [vmem:[%s2210_s3 + $0x164] ss:$8 sps:$4 sm:$0xff]   ;;  %s1796_s2 = sld [smem:[#allocation3 + $0x281]]  ;;  %861 = vmatprep.subr.bf16.mxu1 %v1475_v27  ;;  %v1481_v33 = vld [vmem:[%s2210_s3 + $0x14] ss:$8 sps:$4 sm:$0xff]   ;;  %s1277_s12 = sld [smem:[#allocation5 + $0x2]] }
  0x24   :  { %v142_v10 = vmul.f32 %v141_v8, %v1720_v2  ;;  %v143_v13 = vmul.f32 %v141_v8, %v1731_v5  ;;  %v190_v19 = vmul.f32 %v188_v14, %v1731_v5  ;;  %v154_v20 = vstv %s1733_s21  ;;  %862 = vmatpush1.bf16.msra.mxu1 %v1477_v28  ;;  %v1483_v34 = vld [vmem:[%s2210_s3 + $0x10] ss:$8 sps:$4 sm:$0xff]   ;;  %v1465_v35 = vld [vmem:[%s2210_s3 + $0x160] ss:$8 sps:$4 sm:$0xff]   ;;  %v1466_v36 = vld [vmem:[%s2210_s3 + $0x174] ss:$8 sps:$4 sm:$0xff]  }
  0x25   :  { %180 = vrot.lane.b32.xlu0 %v176_v7, %s1638_s0  ;;  %v155_v22 = vmul.f32 %v154_v20, %v1720_v2  ;;  %v156_v24 = vmul.f32 %v154_v20, %v1731_v5  ;;  %v107_v25 = vstv %s1748_s1  ;;  %v1487_v38 = vld [vmem:[%s2210_s3 + $0x24] ss:$8 sps:$4 sm:$0xff]   ;;  %863 = vmatprep.subr.bf16.mxu1 %v1481_v33  ;;  %v1489_v41 = vld [vmem:[%s2210_s3 + $0x20] ss:$8 sps:$4 sm:$0xff]   ;;  %s1837_s26 = sld [smem:[#allocation3 + $0x201]]  ;;  %vm94_vm1 = vcmask 1031168  }
  0x26   :  { %146 = vrot.lane.b32.xlu1 %v142_v10, %s1638_s0  ;;  %907 = vmatpush1.bf16.msra.mxu0 %v1453_v11  ;;  %v108_v29 = vmul.f32 %v107_v25, %v1720_v2  ;;  %v109_v31 = vmul.f32 %v107_v25, %v1731_v5  ;;  %v1468_v42 = vld [vmem:[%s2210_s3 + $0x170] ss:$8 sps:$4 sm:$0xff]   ;;  %v1493_v43 = vld [vmem:[%s2210_s3 + $0x34] ss:$8 sps:$4 sm:$0xff]   ;;  %v1469_v45 = vld [vmem:[%s2210_s3 + $0x184] ss:$8 sps:$4 sm:$0xff]  }
  0x27   :  { %908 = vmatprep.subr.bf16.mxu0 %v1454_v15  ;;  %v120_v40 = vstv %s1777_s18  ;;  %v1495_v48 = vld [vmem:[%s2210_s3 + $0x30] ss:$8 sps:$4 sm:$0xff]   ;;  %v1471_v49 = vld [vmem:[%s2210_s3 + $0x180] ss:$8 sps:$4 sm:$0xff]   ;;  %v1499_v50 = vld [vmem:[%s2210_s3 + $0x44] ss:$8 sps:$4 sm:$0xff]  }
  0x28   :  { %v71_v32 = vstv %s1764_s29  ;;  %864 = vmatpush1.bf16.msra.mxu1 %v1483_v34  ;;  %v121_v44 = vmul.f32 %v120_v40, %v1720_v2  ;;  %v122_v46 = vmul.f32 %v120_v40, %v1731_v5  ;;  %v1472_v52 = vld [vmem:[%s2210_s3 + $0x194] ss:$8 sps:$4 sm:$0xff]   ;;  %v85_v54 = vstv %s1818_s19  ;;  %s1856_s29 = sld [smem:[#allocation3 + $0x282]]  ;;  %v1501_v55 = vld [vmem:[%s2210_s3 + $0x40] ss:$8 sps:$4 sm:$0xff]   ;;  %s1270_s13 = sld [smem:[#allocation3 + $0x80]] }
  0x29   :  { %182 = vrot.lane.b32.xlu0 %v177_v12, %s1638_s0  ;;  %v72_v37 = vmul.f32 %v71_v32, %v1720_v2  ;;  %v73_v39 = vmul.f32 %v71_v32, %v1731_v5  ;;  %865 = vmatprep.subr.bf16.mxu1 %v1487_v38  ;;  %v243_v47 = vstv %s1796_s2  ;;  %v1474_v56 = vld [vmem:[%s2210_s3 + $0x190] ss:$8 sps:$4 sm:$0xff]   ;;  %v1505_v57 = vld [vmem:[%s2210_s3 + $0x54] ss:$8 sps:$4 sm:$0xff]   ;;  %v86_v58 = vmul.f32 %v85_v54, %v1720_v2  ;;  %s1875_s18 = sld [smem:[#allocation3 + $0x202]]  ;;  %s1999_s14 = sld [smem:[#allocation5 + $0x1]] }
  0x2a   :  { %148 = vrot.lane.b32.xlu1 %v143_v13, %s1638_s0  ;;  %909 = vmatpush1.bf16.msra.mxu0 %v1456_v16  ;;  %v244_v51 = vmul.f32 %v243_v47, %v1720_v2  ;;  %v245_v53 = vmul.f32 %v243_v47, %v1731_v5  ;;  %v1478_v59 = vld [vmem:[%s2210_s3 + $0x1a4] ss:$8 sps:$4 sm:$0xff]   ;;  %v87_v60 = vmul.f32 %v85_v54, %v1731_v5  ;;  %v1507_v62 = vld [vmem:[%s2210_s3 + $0x50] ss:$8 sps:$4 sm:$0xff]   ;;  %v1480_v63 = vld [vmem:[%s2210_s3 + $0x1a0] ss:$8 sps:$4 sm:$0xff]  }
  0x2b   :  { %910 = vmatprep.subr.bf16.mxu0 %v1457_v18  ;;  %v209_v61 = vstv %s1837_s26  ;;  %v1511_v0 = vld [vmem:[%s2210_s3 + $0x64] ss:$8 sps:$4 sm:$0xff]   ;;  %v1484_v3 = vld [vmem:[%s2210_s3 + $0x1b4] ss:$8 sps:$4 sm:$0xff]   ;;  %v1513_v7 = vld [vmem:[%s2210_s3 + $0x60] ss:$8 sps:$4 sm:$0xff]  }
  0x2c   :  { %866 = vmatpush1.bf16.msra.mxu1 %v1489_v41  ;;  %v210_v1 = vmul.f32 %v209_v61, %v1720_v2  ;;  %v211_v4 = vmul.f32 %v209_v61, %v1731_v5  ;;  %v1486_v8 = vld [vmem:[%s2210_s3 + $0x1b0] ss:$8 sps:$4 sm:$0xff]   ;;  %v1517_v9 = vld [vmem:[%s2210_s3 + $0x74] ss:$8 sps:$4 sm:$0xff]   ;;  %v1490_v11 = vld [vmem:[%s2210_s3 + $0x1c4] ss:$8 sps:$4 sm:$0xff]   ;;  %v167_v61 = vstv %s1277_s12 }
  0x2d   :  { %193 = vrot.lane.b32.xlu0 %v189_v17, %s1639_s15  ;;  %867 = vmatprep.subr.bf16.mxu1 %v1493_v43  ;;  %v1519_v14 = vld [vmem:[%s2210_s3 + $0x70] ss:$8 sps:$4 sm:$0xff]   ;;  %v1492_v15 = vld [vmem:[%s2210_s3 + $0x1c0] ss:$8 sps:$4 sm:$0xff]   ;;  %v1523_v16 = vld [vmem:[%s2210_s3 + $0x84] ss:$8 sps:$4 sm:$0xff]  }
  0x2e   :  { %195 = vrot.lane.b32.xlu1 %v190_v19, %s1639_s15  ;;  %911 = vmatpush1.bf16.msra.mxu0 %v1459_v21  ;;  %v256_v6 = vstv %s1856_s29  ;;  %v1496_v18 = vld [vmem:[%s2210_s3 + $0x1d4] ss:$8 sps:$4 sm:$0xff]   ;;  %v1525_v20 = vld [vmem:[%s2210_s3 + $0x80] ss:$8 sps:$4 sm:$0xff]   ;;  %v1640_v40 = vmov 0   ;;  %s67_s26 = sld [smem:[#allocation3]] }
  0x2f   :  { %912 = vmatprep.subr.bf16.mxu0 %v1460_v23  ;;  %v257_v10 = vmul.f32 %v256_v6, %v1720_v2  ;;  %v258_v12 = vmul.f32 %v256_v6, %v1731_v5  ;;  %v222_v13 = vstv %s1875_s18  ;;  %v1498_v21 = vld [vmem:[%s2210_s3 + $0x1d0] ss:$8 sps:$4 sm:$0xff]   ;;  %v1535_v25 = vld [vmem:[%s2210_s3 + $0xa4] ss:$8 sps:$4 sm:$0xff]   ;;  %v1537_v27 = vld [vmem:[%s2210_s3 + $0xa0] ss:$8 sps:$4 sm:$0xff]  }
  0x30   :  { %868 = vmatpush1.bf16.msra.mxu1 %v1495_v48  ;;  %v223_v17 = vmul.f32 %v222_v13, %v1720_v2  ;;  %v224_v19 = vmul.f32 %v222_v13, %v1731_v5  ;;  %v1502_v5 = vld [vmem:[%s2210_s3 + $0x1e4] ss:$8 sps:$4 sm:$0xff]   ;;  %v1531_v23 = vld [vmem:[%s2210_s3 + $0x90] ss:$8 sps:$4 sm:$0xff]   ;;  %v1549_v33 = vld [vmem:[%s2210_s3 + $0xc0] ss:$8 sps:$4 sm:$0xff]  }
  0x31   :  { %159 = vrot.lane.b32.xlu0 %v155_v22, %s1639_s15  ;;  %869 = vmatprep.subr.bf16.mxu1 %v1499_v50  ;;  %v1529_v22 = vld [vmem:[%s2210_s3 + $0x94] ss:$8 sps:$4 sm:$0xff]   ;;  %v1510_v28 = vld [vmem:[%s2210_s3 + $0x1f0] ss:$8 sps:$4 sm:$0xff]   ;;  %v1547_v32 = vld [vmem:[%s2210_s3 + $0xc4] ss:$8 sps:$4 sm:$0xff]  }
  0x32   :  { %161 = vrot.lane.b32.xlu1 %v156_v24, %s1639_s15  ;;  %913 = vmatpush1.bf16.msra.mxu0 %v1462_v26  ;;  %v1504_v24 = vld [vmem:[%s2210_s3 + $0x1e0] ss:$8 sps:$4 sm:$0xff]   ;;  %v1508_v26 = vld [vmem:[%s2210_s3 + $0x1f4] ss:$8 sps:$4 sm:$0xff]   ;;  %s1274_s18 = sld [smem:[#allocation3 + $0x100]]  ;;  %vm1107_vm2 = vcmask 1043456  }
  0x33   :  { %914 = vmatprep.subr.bf16.mxu0 %v1463_v30  ;;  %v1516_v30 = vld [vmem:[%s2210_s3 + $0x204] ss:$8 sps:$4 sm:$0xff]   ;;  %v1553_v34 = vld [vmem:[%s2210_s3 + $0xd4] ss:$8 sps:$4 sm:$0xff]   ;;  %s2012_s29 = sld [smem:[#allocation3 + $0x280]]  ;;  %vm1103_vm3 = vcmask 719872  }
  0x34   :  { %870 = vmatpush1.bf16.msra.mxu1 %v1501_v55  ;;  %v1565_v38 = vld [vmem:[%s2210_s3 + $0xf4] ss:$8 sps:$4 sm:$0xff]   ;;  %v201_v55 = vstv %s1281_s30  ;;  %s2014_s23 = sld [smem:[#allocation3 + $0x200]]  ;;  %vm1642_vm4 = vmmov 0   ;;  %vm1200_vm5 = vcmask 654336   ;;  %vm1253_vm6 = vcmask 162816  }
  0x35   :  { %112 = vrot.lane.b32.xlu0 %v108_v29, %s1638_s0  ;;  %871 = vmatprep.subr.bf16.mxu1 %v1505_v57  ;;  %v1541_v29 = vld [vmem:[%s2210_s3 + $0xb4] ss:$8 sps:$4 sm:$0xff]   ;;  %s2020_s25 = sld [smem:[#allocation5]]  ;;  %vm1260_vm7 = vcmask 7168  }
  0x36   :  { %114 = vrot.lane.b32.xlu1 %v109_v31, %s1638_s0  ;;  %915 = vmatpush1.bf16.msra.mxu0 %v1465_v35  ;;  %v1543_v31 = vld [vmem:[%s2210_s3 + $0xb0] ss:$8 sps:$4 sm:$0xff]  }
  0x37   :  { %916 = vmatprep.subr.bf16.mxu0 %v1466_v36  ;;  %v1555_v35 = vld [vmem:[%s2210_s3 + $0xd0] ss:$8 sps:$4 sm:$0xff]   ;;  %v1559_v36 = vld [vmem:[%s2210_s3 + $0xe4] ss:$8 sps:$4 sm:$0xff]  }
  0x38   :  { %872 = vmatpush1.bf16.msra.mxu1 %v1507_v62  ;;  %v138_v48 = vstv %s1274_s18 }
  0x39   :  { %76 = vrot.lane.b32.xlu0 %v72_v37, %s1638_s0  ;;  %873 = vmatprep.subr.bf16.mxu1 %v1511_v0  ;;  %v1561_v37 = vld [vmem:[%s2210_s3 + $0xe0] ss:$8 sps:$4 sm:$0xff]  }
  0x3a   :  { %78 = vrot.lane.b32.xlu1 %v73_v39, %s1638_s0  ;;  %917 = vmatpush1.bf16.msra.mxu0 %v1468_v42  ;;  %v1567_v39 = vld [vmem:[%s2210_s3 + $0xf0] ss:$8 sps:$4 sm:$0xff]  }
  0x3b   :  { %918 = vmatprep.subr.bf16.mxu0 %v1469_v45 }
  0x3c   :  { %874 = vmatpush1.bf16.msra.mxu1 %v1513_v7 }
  0x3d   :  { %125 = vrot.lane.b32.xlu0 %v121_v44, %s1639_s15  ;;  %875 = vmatprep.subr.bf16.mxu1 %v1517_v9 }
  0x3e   :  { %127 = vrot.lane.b32.xlu1 %v122_v46, %s1639_s15  ;;  %919 = vmatpush1.bf16.msra.mxu0 %v1471_v49 }
  0x3f   :  { %920 = vmatprep.subr.bf16.mxu0 %v1472_v52 }
  0x40   :  { %876 = vmatpush1.bf16.msra.mxu1 %v1519_v14  ;;  %v1522_v14 = vld [vmem:[%s2210_s3 + $0x214] ss:$8 sps:$4 sm:$0xff]  }
  0x41   :  { %248 = vrot.lane.b32.xlu0 %v244_v51, %s1638_s0  ;;  %877 = vmatprep.subr.bf16.mxu1 %v1523_v16  ;;  %v139_v51 = vmul.f32 %v138_v48, %v1720_v2 }
  0x42   :  { %250 = vrot.lane.b32.xlu1 %v245_v53, %s1638_s0  ;;  %921 = vmatpush1.bf16.msra.mxu0 %v1474_v56 }
  0x43   :  { %922 = vmatprep.subr.bf16.mxu0 %v1478_v59 }
  0x44   :  { %878 = vmatpush1.bf16.msra.mxu1 %v1525_v20  ;;  %v1528_v20 = vld [vmem:[%s2210_s3 + $0x224] ss:$8 sps:$4 sm:$0xff]  }
  0x45   :  { %90 = vrot.lane.b32.xlu0 %v86_v58, %s1639_s15  ;;  %879 = vmatprep.subr.bf16.mxu1 %v1529_v22 }
  0x46   :  { %92 = vrot.lane.b32.xlu1 %v87_v60, %s1639_s15  ;;  %923 = vmatpush1.bf16.msra.mxu0 %v1480_v63 }
  0x47   :  { %924 = vmatprep.subr.bf16.mxu0 %v1484_v3 }
  0x48   :  { %880 = vmatpush1.bf16.msra.mxu1 %v1531_v23 }
  0x49   :  { %214 = vrot.lane.b32.xlu0 %v210_v1, %s1638_s0  ;;  %881 = vmatprep.subr.bf16.mxu1 %v1535_v25  ;;  %v104_v1 = vstv %s1270_s13  ;;  %v1526_v25 = vld [vmem:[%s2210_s3 + $0x220] ss:$8 sps:$4 sm:$0xff]   ;;  %s2041_s13 = sld [smem:[#allocation5 + $0x5]] }
  0x4a   :  { %216 = vrot.lane.b32.xlu1 %v211_v4, %s1638_s0  ;;  %925 = vmatpush1.bf16.msra.mxu0 %v1486_v8  ;;  %s1278_s0 = sld [smem:[#allocation3 + $0x180]]  ;;  %v105_v9 = vmul.f32 %v104_v1, %v1720_v2 }
  0x4b   :  { %926 = vmatprep.subr.bf16.mxu0 %v1490_v11 }
  0x4c   :  { %882 = vmatpush1.bf16.msra.mxu1 %v1537_v27 }
  0x4d   :  { %261 = vrot.lane.b32.xlu0 %v257_v10, %s1639_s15  ;;  %883 = vmatprep.subr.bf16.mxu1 %v1541_v29  ;;  %v1514_v10 = vld [vmem:[%s2210_s3 + $0x200] ss:$8 sps:$4 sm:$0xff]  }
  0x4e   :  { %263 = vrot.lane.b32.xlu1 %v258_v12, %s1639_s15  ;;  %927 = vmatpush1.bf16.msra.mxu0 %v1492_v15 }
  0x4f   :  { %928 = vmatprep.subr.bf16.mxu0 %v1496_v18  ;;  %v68_v18 = vstv %s67_s26  ;;  %s1285_s26 = sld [smem:[#allocation5 + $0x4]] }
  0x50   :  { %884 = vmatpush1.bf16.msra.mxu1 %v1543_v31  ;;  %v172_v43 = vstv %s1278_s0  ;;  %v69_v23 = vmul.f32 %v68_v18, %v1720_v2  ;;  %v1568_v18 = vld [vmem:[%s2210_s3 + $0x290] ss:$8 sps:$4 sm:$0xff]  }
  0x51   :  { %227 = vrot.lane.b32.xlu0 %v223_v17, %s1639_s15  ;;  %885 = vmatprep.subr.bf16.mxu1 %v1547_v32  ;;  %v173_v45 = vmul.f32 %v172_v43, %v1720_v2  ;;  %v1520_v17 = vld [vmem:[%s2210_s3 + $0x210] ss:$8 sps:$4 sm:$0xff]  }
  0x52   :  { %229 = vrot.lane.b32.xlu1 %v224_v19, %s1639_s15  ;;  %929 = vmatpush1.bf16.msra.mxu0 %v1498_v21 }
  0x53   :  { %930 = vmatprep.subr.bf16.mxu0 %v1502_v5  ;;  %v133_v5 = vstv %s1999_s14 }
  0x54   :  { %886 = vmatpush1.bf16.msra.mxu1 %v1549_v33  ;;  %v1532_v33 = vld [vmem:[%s2210_s3 + $0x230] ss:$8 sps:$4 sm:$0xff]  }
  0x55   :  { %887 = vmatprep.subr.bf16.mxu1 %v1553_v34  ;;  %v240_v34 = vstv %s2012_s29 }
  0x56   :  { %931 = vmatpush1.bf16.msra.mxu0 %v1504_v24  ;;  %v241_v43 = vmul.f32 %v240_v34, %v1720_v2 }
  0x57   :  { %932 = vmatprep.subr.bf16.mxu0 %v1508_v26 }
  0x58   :  { %888 = vmatpush1.bf16.msra.mxu1 %v1555_v35 }
  0x59   :  { %889 = vmatprep.subr.bf16.mxu1 %v1559_v36  ;;  %v206_v36 = vstv %s2014_s23 }
  0x5a   :  { %933 = vmatpush1.bf16.msra.mxu0 %v1510_v28  ;;  %v1534_v28 = vld [vmem:[%s2210_s3 + $0x234] ss:$8 sps:$4 sm:$0xff]  }
  0x5b   :  { %943 = vmatprep.subr.bf16.mxu0 %v1516_v30 }
  0x5c   :  { %890 = vmatpush1.bf16.msra.mxu1 %v1561_v37  ;;  %v1540_v37 = vld [vmem:[%s2210_s3 + $0x244] ss:$8 sps:$4 sm:$0xff]  }
  0x5d   :  { %891 = vmatprep.subr.bf16.mxu1 %v1565_v38 }
  0x60   :  { %892 = vmatpush1.bf16.msra.mxu1 %v1567_v39 }
  0x61   :  { %1111 = vmatprep.subr.bf16.mxu1 %v1640_v40 }
  0x97   :  { %v181_v41 = vpop.permute.xlu0 %180 }
  0x98   :  { %v147_v42 = vpop.permute.xlu1 %146 }
  0x9b   :  { %v183_v44 = vpop.permute.xlu0 %182 }
  0x9c   :  { %v149_v46 = vpop.permute.xlu1 %148  ;;  %v184_v47 = vsel %vm80_vm0, %v181_v41, %v183_v44  ;;  %v99_v41 = vstv %s2020_s25 }
  0x9d   :  { %v186_v50 = vadd.f32 %v184_v47, %v173_v45  ;;  %v150_v53 = vsel %vm80_vm0, %v147_v42, %v149_v46  ;;  %v207_v45 = vmul.f32 %v206_v36, %v1720_v2  ;;  %v1538_v46 = vld [vmem:[%s2210_s3 + $0x240] ss:$8 sps:$4 sm:$0xff]   ;;  %v1595_v36 = vld [vmem:[%s2212_s5 + $0x30] sm:$0xff]  }
  0x9e   :  { %v152_v58 = vadd.f32 %v150_v53, %v139_v51 }
  0x9f   :  { %v194_v49 = vpop.permute.xlu0 %193 }
  0xa0   :  { %v196_v52 = vpop.permute.xlu1 %195 }
  0xa1   :  { %v197_v54 = vsel %vm94_vm1, %v194_v49, %v196_v52  ;;  %v1546_v49 = vld [vmem:[%s2210_s3 + $0x254] ss:$8 sps:$4 sm:$0xff]  }
  0xa2   :  { %v199_v56 = vadd.f32 %v197_v54, %v186_v50 }
  0xa3   :  { %v160_v57 = vpop.permute.xlu0 %159 }
  0xa4   :  { %v162_v59 = vpop.permute.xlu1 %161  ;;  %v202_v60 = vadd.f32 %v201_v55, %v199_v56  ;;  %v1544_v55 = vld [vmem:[%s2210_s3 + $0x250] ss:$8 sps:$4 sm:$0xff]  }
  0xa5   :  { %v163_v62 = vsel %vm94_vm1, %v160_v57, %v162_v59  ;;  %v1589_v57 = vld [vmem:[%s2212_s5] sm:$0xff]  }
  0xa6   :  { %v165_v63 = vadd.f32 %v163_v62, %v152_v58  ;;  %v203_v0 = vmax.f32 %v202_v60, 0.0  ;;  %v1552_v58 = vld [vmem:[%s2210_s3 + $0x264] ss:$8 sps:$4 sm:$0xff]  }
  0xa7   :  { %v113_v3 = vpop.permute.xlu0 %112 }
  0xa8   :  { %v168_v4 = vadd.f32 %v167_v61, %v165_v63  ;;  %v204_v6 = vpack.c.bf16 %v203_v0, %v203_v0  ;;  %v115_v7 = vpop.permute.xlu1 %114  ;;  %v269_v61 = vstv %s2041_s13  ;;  %v1550_v0 = vld [vmem:[%s2210_s3 + $0x260] ss:$8 sps:$4 sm:$0xff]  }
  0xa9   :  { %v116_v11 = vsel %vm80_vm0, %v113_v3, %v115_v7  ;;  %v1590_v3 = vld [vmem:[%s2212_s5 + $0x8] sm:$0xff]  }
  0xaa   :  { %934 = vmatprep.mubr.bf16.mxu0 %v204_v6  ;;  %v169_v8 = vmax.f32 %v168_v4, 0.0  ;;  %v118_v16 = vadd.f32 %v116_v11, %v105_v9  ;;  %v1558_v4 = vld [vmem:[%s2210_s3 + $0x274] ss:$8 sps:$4 sm:$0xff]   ;;  %v1556_v11 = vld [vmem:[%s2210_s3 + $0x270] ss:$8 sps:$4 sm:$0xff]  }
  0xab   :  { %v77_v12 = vpop.permute.xlu0 %76 }
  0xac   :  { %v170_v13 = vpack.c.bf16 %v169_v8, %v169_v8  ;;  %v79_v15 = vpop.permute.xlu1 %78 }
  0xad   :  { %v81_v26 = vsel %vm80_vm0, %v77_v12, %v79_v15  ;;  %v1591_v12 = vld [vmem:[%s2212_s5 + $0x10] sm:$0xff]   ;;  %v1562_v15 = vld [vmem:[%s2210_s3 + $0x280] ss:$8 sps:$4 sm:$0xff]  }
  0xae   :  { %935 = vmatmul.mubr.bf16.vlgmr.msra.gmra.mrb[0].mxu0 %v170_v13  ;;  %v83_v31 = vadd.f32 %v81_v26, %v69_v23  ;;  %v1564_v13 = vld [vmem:[%s2210_s3 + $0x284] ss:$8 sps:$4 sm:$0xff]   ;;  %v1574_v23 = vld [vmem:[%s2210_s3 + $0x2b0] ss:$8 sps:$4 sm:$0xff]   ;;  %v1582_v26 = vld [vmem:[%s2210_s3 + $0x2d4] ss:$8 sps:$4 sm:$0xff]  }
  0xaf   :  { %944 = vmatpush1.bf16.msra.mxu0 %v1514_v10  ;;  %v126_v19 = vpop.permute.xlu0 %125 }
  0xb0   :  { %945 = vmatprep.subr.bf16.mxu0 %v1522_v14  ;;  %v128_v21 = vpop.permute.xlu1 %127 }
  0xb1   :  { %v129_v22 = vsel %vm94_vm1, %v126_v19, %v128_v21  ;;  %v1593_v19 = vld [vmem:[%s2212_s5 + $0x20] sm:$0xff]  }
  0xb2   :  { %v131_v24 = vadd.f32 %v129_v22, %v118_v16  ;;  %v1592_v16 = vld [vmem:[%s2212_s5 + $0x18] sm:$0xff]   ;;  %v1571_v21 = vld [vmem:[%s2210_s3 + $0x2a0] ss:$8 sps:$4 sm:$0xff]  }
  0xb3   :  { %946 = vmatpush1.bf16.msra.mxu0 %v1520_v17  ;;  %v249_v27 = vpop.permute.xlu0 %248  ;;  %v1570_v17 = vld [vmem:[%s2210_s3 + $0x294] ss:$8 sps:$4 sm:$0xff]   ;;  %v1594_v22 = vld [vmem:[%s2212_s5 + $0x28] sm:$0xff]  }
  0xb4   :  { %947 = vmatprep.subr.bf16.mxu0 %v1528_v20  ;;  %v251_v29 = vpop.permute.xlu1 %250  ;;  %v134_v30 = vadd.f32 %v133_v5, %v131_v24  ;;  %v1573_v20 = vld [vmem:[%s2210_s3 + $0x2a4] ss:$8 sps:$4 sm:$0xff]   ;;  %v1576_v5 = vld [vmem:[%s2210_s3 + $0x2b4] ss:$8 sps:$4 sm:$0xff]  }
  0xb5   :  { %v252_v47 = vsel %vm80_vm0, %v249_v27, %v251_v29  ;;  %v1579_v24 = vld [vmem:[%s2210_s3 + $0x2c4] ss:$8 sps:$4 sm:$0xff]   ;;  %v1580_v27 = vld [vmem:[%s2210_s3 + $0x2d0] ss:$8 sps:$4 sm:$0xff]   ;;  %v235_v29 = vstv %s1285_s26 }
  0xb6   :  { %v135_v32 = vmax.f32 %v134_v30, 0.0  ;;  %v254_v2 = vadd.f32 %v252_v47, %v241_v43  ;;  %v1583_v30 = vld [vmem:[%s2210_s3 + $0x2e0] ss:$8 sps:$4 sm:$0xff]  }
  0xb7   :  { %948 = vmatpush1.bf16.msra.mxu0 %v1526_v25  ;;  %v91_v35 = vpop.permute.xlu0 %90  ;;  %v1577_v25 = vld [vmem:[%s2210_s3 + $0x2c0] ss:$8 sps:$4 sm:$0xff]  }
  0xb8   :  { %949 = vmatprep.subr.bf16.mxu0 %v1534_v28  ;;  %v93_v38 = vpop.permute.xlu1 %92  ;;  %v136_v39 = vpack.c.bf16 %v135_v32, %v135_v32  ;;  %v1585_v28 = vld [vmem:[%s2210_s3 + $0x2e4] ss:$8 sps:$4 sm:$0xff]   ;;  %v1588_v32 = vld [vmem:[%s2210_s3 + $0x2f4] ss:$8 sps:$4 sm:$0xff]  }
  0xb9   :  { %v95_v42 = vsel %vm94_vm1, %v91_v35, %v93_v38  ;;  %v1597_v38 = vld [vmem:[%s2212_s5 + $0x40] sm:$0xff]  }
  0xba   :  { %v97_v44 = vadd.f32 %v95_v42, %v83_v31  ;;  %893 = vmatprep.mubr.bf16.mxu1 %v136_v39  ;;  %v1598_v39 = vld [vmem:[%s2212_s5 + $0x48] sm:$0xff]   ;;  %v1600_v42 = vld [vmem:[%s2212_s5 + $0x58] sm:$0xff]   ;;  %v1601_v43 = vld [vmem:[%s2212_s5 + $0x60] sm:$0xff]  }
  0xbb   :  { %950 = vmatpush1.bf16.msra.mxu0 %v1532_v33  ;;  %v215_v48 = vpop.permute.xlu0 %214  ;;  %v1586_v33 = vld [vmem:[%s2210_s3 + $0x2f0] ss:$8 sps:$4 sm:$0xff]  }
  0xbc   :  { %951 = vmatprep.subr.bf16.mxu0 %v1540_v37  ;;  %v100_v50 = vadd.f32 %v99_v41, %v97_v44  ;;  %v217_v51 = vpop.permute.xlu1 %216  ;;  %v1596_v37 = vld [vmem:[%s2212_s5 + $0x38] sm:$0xff]   ;;  %v1599_v41 = vld [vmem:[%s2212_s5 + $0x50] sm:$0xff]   ;;  %v1602_v44 = vld [vmem:[%s2212_s5 + $0x68] ss:$0 sps:$4 sm:$0xff]  }
  0xbd   :  { %v218_v52 = vsel %vm80_vm0, %v215_v48, %v217_v51  ;;  %v371_v51 = vlaneseq }
  0xbe   :  { %v220_v53 = vadd.f32 %v218_v52, %v207_v45  ;;  %v101_v54 = vmax.f32 %v100_v50, 0.0  ;;  %v1109_v45 = vsel %vm1107_vm2, %v1602_v44, 0 }
  0xbf   :  { %952 = vmatpush1.bf16.msra.mxu0 %v1538_v46  ;;  %v262_v56 = vpop.permute.xlu0 %261  ;;  %v1641_v46 = vmov 0.0   ;;  %v372_v52 = vshrl.u32 %v371_v51, 7 }
  0xc0   :  { %953 = vmatprep.subr.bf16.mxu0 %v1546_v49  ;;  %v102_v59 = vpack.c.bf16 %v101_v54, %v101_v54  ;;  %v264_v60 = vpop.permute.xlu1 %263 }
  0xc1   :  { %v265_v62 = vsel %vm94_vm1, %v262_v56, %v264_v60 }
  0xc2   :  { %894 = vmatmul.mubr.bf16.vlgmr.msra.gmra.mrb[0].mxu1 %v102_v59  ;;  %v267_v63 = vadd.f32 %v265_v62, %v254_v2  ;;  %v373_v2 = vsub.s32 0, %v372_v52 }
  0xc3   :  { %954 = vmatpush1.bf16.msra.mxu0 %v1544_v55  ;;  %v228_v1 = vpop.permute.xlu0 %227  ;;  %1112 = vmatpush1.bf16.msra.mxu1 %v1589_v57 }
  0xc4   :  { %955 = vmatprep.subr.bf16.mxu0 %v1552_v58  ;;  %v270_v6 = vadd.f32 %v269_v61, %v267_v63  ;;  %v230_v7 = vpop.permute.xlu1 %229  ;;  %1113 = vmatprep.subr.bf16.mxu1 %v1640_v40 }
  0xc5   :  { %v231_v8 = vsel %vm94_vm1, %v228_v1, %v230_v7  ;;  %v1604_v7 = vld [vmem:[%s2214_s7 + $0x8] sm:$0xff]  }
  0xc6   :  { %v233_v9 = vadd.f32 %v231_v8, %v220_v53  ;;  %v271_v10 = vmax.f32 %v270_v6, 0.0  ;;  %v377_v53 = vsub.s32 1, %v372_v52  ;;  %v1605_v8 = vld [vmem:[%s2214_s7 + $0x10] sm:$0xff]  }
  0xc7   :  { %956 = vmatpush1.bf16.msra.mxu0 %v1550_v0  ;;  %1114 = vmatpush1.bf16.msra.mxu1 %v1590_v3 }
  0xc8   :  { %957 = vmatprep.subr.bf16.mxu0 %v1558_v4  ;;  %v272_v14 = vpack.c.bf16 %v271_v10, %v271_v10  ;;  %1115 = vmatprep.subr.bf16.mxu1 %v1640_v40  ;;  %v236_v31 = vadd.f32 %v235_v29, %v233_v9  ;;  %v1603_v4 = vld [vmem:[%s2214_s7] sm:$0xff]   ;;  %v1606_v9 = vld [vmem:[%s2214_s7 + $0x18] sm:$0xff]  }
  0xc9   :  { %v1607_v10 = vld [vmem:[%s2214_s7 + $0x20] sm:$0xff]  }
  0xca   :  { %975 = vmatprep.mubr.bf16.mxu0 %v272_v14  ;;  %v237_v34 = vmax.f32 %v236_v31, 0.0 }
  0xcb   :  { %958 = vmatpush1.bf16.msra.mxu0 %v1556_v11  ;;  %1116 = vmatpush1.bf16.msra.mxu1 %v1591_v12  ;;  %v1386_v11 = vld [vmem:[%s2213_s6] ss:$0 sm:$0xff] }
  0xcc   :  { %959 = vmatprep.subr.bf16.mxu0 %v1564_v13  ;;  %1117 = vmatprep.subr.bf16.mxu1 %v1640_v40  ;;  %v238_v35 = vpack.c.bf16 %v237_v34, %v237_v34 }
  0xcf   :  { %960 = vmatpush1.bf16.msra.mxu0 %v1562_v15  ;;  %1118 = vmatpush1.bf16.msra.mxu1 %v1592_v16 }
  0xd0   :  { %961 = vmatprep.subr.bf16.mxu0 %v1570_v17  ;;  %1119 = vmatprep.subr.bf16.mxu1 %v1640_v40 }
  0xd3   :  { %962 = vmatpush1.bf16.msra.mxu0 %v1568_v18  ;;  %1120 = vmatpush1.bf16.msra.mxu1 %v1593_v19  ;;  %v1402_v19 = vld [vmem:[%s2215_s8] ss:$0 sm:$0xff] }
  0xd4   :  { %963 = vmatprep.subr.bf16.mxu0 %v1573_v20  ;;  %1121 = vmatprep.subr.bf16.mxu1 %v1640_v40 }
  0xd7   :  { %964 = vmatpush1.bf16.msra.mxu0 %v1571_v21  ;;  %1122 = vmatpush1.bf16.msra.mxu1 %v1594_v22 }
  0xd8   :  { %965 = vmatprep.subr.bf16.mxu0 %v1576_v5  ;;  %1123 = vmatprep.subr.bf16.mxu1 %v1640_v40 }
  0xdb   :  { %966 = vmatpush1.bf16.msra.mxu0 %v1574_v23  ;;  %1124 = vmatpush1.bf16.msra.mxu1 %v1595_v36  ;;  %v1409_v23 = vld [vmem:[%s2216_s9] ss:$0 sm:$0xff] }
  0xdc   :  { %967 = vmatprep.subr.bf16.mxu0 %v1579_v24  ;;  %1125 = vmatprep.subr.bf16.mxu1 %v1640_v40 }
  0xdf   :  { %968 = vmatpush1.bf16.msra.mxu0 %v1577_v25  ;;  %1126 = vmatpush1.bf16.msra.mxu1 %v1596_v37 }
  0xe0   :  { %969 = vmatprep.subr.bf16.mxu0 %v1582_v26  ;;  %1127 = vmatprep.subr.bf16.mxu1 %v1640_v40 }
  0xe3   :  { %970 = vmatpush1.bf16.msra.mxu0 %v1580_v27  ;;  %1128 = vmatpush1.bf16.msra.mxu1 %v1597_v38 }
  0xe4   :  { %971 = vmatprep.subr.bf16.mxu0 %v1585_v28  ;;  %1129 = vmatprep.subr.bf16.mxu1 %v1640_v40  ;;  %v1258_v28 = vstv %s2217_s10 }
  0xe7   :  { %972 = vmatpush1.bf16.msra.mxu0 %v1583_v30  ;;  %1130 = vmatpush1.bf16.msra.mxu1 %v1598_v39 }
  0xe8   :  { %973 = vmatprep.subr.bf16.mxu0 %v1588_v32  ;;  %1131 = vmatprep.subr.bf16.mxu1 %v1640_v40 }
  0xeb   :  { %974 = vmatpush1.bf16.msra.mxu0 %v1586_v33  ;;  %1132 = vmatpush1.bf16.msra.mxu1 %v1599_v41 }
  0xec   :  { %1133 = vmatprep.subr.bf16.mxu1 %v1640_v40 }
  0xee   :  { %976 = vmatmul.mubr.bf16.vlgmr.msra.gmra.mrb[0].mxu0 %v238_v35 }
  0xef   :  { %1134 = vmatpush1.bf16.msra.mxu1 %v1600_v42 }
  0xf0   :  { %1135 = vmatprep.subr.bf16.mxu1 %v1640_v40 }
  0xf3   :  { %1136 = vmatpush1.bf16.msra.mxu1 %v1601_v43 }
  0xf4   :  { %1137 = vmatprep.subr.bf16.mxu1 %v1640_v40  ;;  %v369_v40 = vld [vmem:[%s2211_s4] sm:$0x3] }
  0xf5   :  { %v374_v54 = vrot.slane %v369_v40, %v373_v2  ;;  %v378_v55 = vrot.slane %v369_v40, %v377_v53 }
  0xf7   :  { %1138 = vmatpush1.bf16.msra.mxu1 %v1109_v45 }
  0xf8   :  { %1416 = vmatprep.subr.bf16.mxu1 %v1641_v46 }
 0x195   :  { %v895_v47 = vpop.f32.mrb[0].mxu1 }
 0x196   :  { %v897_v48 = vpop.f32.mrb[1].mxu1  ;;  %v896_v56 = vadd.f32 %v895_v47, %v374_v54 }
 0x197   :  { %v899_v49 = vpop.f32.mrb[2].mxu1  ;;  %v898_v57 = vadd.f32 %v897_v48, %v378_v55 }
 0x198   :  { %v900_v50 = vpop.f32.mrb[3].mxu1 }
 0x1c1   :  { %v977_v58 = vpop.f32.mrb[0].mxu0 }
 0x1c2   :  { %v1431_v59 = vadd.f32 %v977_v58, %v896_v56  ;;  %v979_v60 = vpop.f32.mrb[1].mxu0 }
 0x1c3   :  { %v1433_v61 = vadd.f32 %v979_v60, %v898_v57  ;;  %v981_v62 = vpop.f32.mrb[2].mxu0 }
 0x1c4   :  { %v984_v63 = vmax.f32 %v1431_v59, 0.0  ;;  %v982_v0 = vpop.f32.mrb[3].mxu0 }
 0x1c5   :  { %v985_v1 = vmax.f32 %v1433_v61, 0.0 }
 0x1c6   :  { %v986_v6 = vpack.c.bf16 %v984_v63, %v984_v63 }
 0x1c7   :  { %v987_v3 = vpack.c.bf16 %v985_v1, %v985_v1 }
 0x1c9   :  { %1401 = vmatprep.mubr.msk.bf16.mxu1 %vm1103_vm3, %v987_v3 }
 0x1ca   :  { %1144 = vmatmul.mubr.bf16.vlgmr.msra.gmra.mrb[4].mxu1 %v986_v6 }
 0x1cb   :  { %1417 = vmatpush3.bf16.msra.mxu1 %v1603_v4  ;;  %1426 = vmatprep.mubr.msk.bf16.mxu1 %vm1642_vm4, %v1641_v46 }
 0x1cc   :  { %1418 = vmatprep.subr.bf16.mxu1 %v1641_v46 }
 0x1cf   :  { %1419 = vmatpush3.bf16.msra.mxu1 %v1604_v7 }
 0x1d0   :  { %1420 = vmatprep.subr.bf16.mxu1 %v1641_v46 }
 0x1d3   :  { %1421 = vmatpush3.bf16.msra.mxu1 %v1605_v8 }
 0x1d4   :  { %1422 = vmatprep.subr.bf16.mxu1 %v1641_v46 }
 0x1d7   :  { %1423 = vmatpush3.bf16.msra.mxu1 %v1606_v9 }
 0x1d8   :  { %1424 = vmatprep.subr.bf16.mxu1 %v1641_v46 }
 0x1db   :  { %1425 = vmatpush3.bf16.msra.mxu1 %v1607_v10 }
 0x29d   :  { %v1145_v12 = vpop.f32.mrb[4].mxu1 }
 0x29e   :  { %v1146_v13 = vadd.f32 %v1386_v11, %v1145_v12  ;;  %v1147_v14 = vpop.f32.mrb[5].mxu1 }
 0x29f   :  { %v1148_v15 = vpop.f32.mrb[6].mxu1 }
 0x2a0   :  { %v1151_v16 = vmax.f32 %v1146_v13, 0.0  ;;  %v1149_v17 = vpop.f32.mrb[7].mxu1 }
 0x2a2   :  { %v1152_v18 = vpack.c.bf16 %v1151_v16, %v1151_v16 }
 0x2a4   :  { %1427 = vmatmul.mubr.msk.bf16.vlgmr.msra.gmra.mrb[8].mxu1 %vm1200_vm5, %v1152_v18 }
 0x377   :  { %v1238_v20 = vpop.f32.mrb[8].mxu1 }
 0x378   :  { %v1239_v21 = vadd.f32 %v1402_v19, %v1238_v20  ;;  %v1428_v22 = vpop.f32.mrb[9].mxu1 }
 0x379   :  { %v1241_v5 = vpop.f32.mrb[10].mxu1 }
 0x37a   :  { %v1244_v24 = vmax.f32 %v1239_v21, 0.0  ;;  %v1429_v25 = vpop.f32.mrb[11].mxu1 }
 0x37c   :  { %v1252_v26 = vmul.f32 %v1409_v23, %v1244_v24 }
 0x37e   :  { %v1254_v27 = vsel %vm1253_vm6, %v1252_v26, 0.0 }
 0x37f   :  { %1255 = vadd.xlane.f32.xlu0 %v1254_v27 }
 0x40c   :  { %v1256_v29 = vpop.xlane.xlu0 %1255 }
 0x40d   :  { %v1259_v30 = vadd.f32 %v1258_v28, %v1256_v29 }
 0x40f   :  { %1261 = vst.msk [vmem:[%s2218_s11] sm:$0xff] %vm1260_vm7, %v1259_v30 }
 0x410   :  { %1266 = vsyncpa [#allocation4], 1 }
 0x411   :  { %1267 = vsyncpa [#allocation6], 1 }

</bundles_post_ra>
